<compile_context>
chip_gen: v7x
topology: tpu7x:2x2x1
jax: 0.10.0
libtpu: 0.0.40
codegen_flags: <defaults>
</compile_context>

<pallas_src>
import functools

import jax
import jax.numpy as jnp
from jax.experimental import pallas as pl
from jax.experimental.pallas import tpu as pltpu

LANE = 128  # TPU vreg lane width


def _round_up(x, m):
    return (x + m - 1) // m * m


def _pick_tile(n, preferred):
    """Largest power-of-two tile <= preferred that divides n (n multiple of 128)."""
    t = min(preferred, n)
    while n % t:
        t //= 2
    return t


def _vmem_limit_bytes():
    cap = 64 << 20  # conservative fallback (safe on v7x's 64 MiB per TC)
    try:
        cap = int(pltpu.get_tpu_info().vmem_capacity_bytes)
    except Exception:
        pass
    return max(32 << 20, cap - (8 << 20))  # leave headroom for Mosaic scratch


# ---------------------------------------------------------------------------
# Kernels
# ---------------------------------------------------------------------------
def _transform_kernel(h_ref, w_ref, b_ref, o_ref, *, fuse_bias_relu):
    """One row tile of  H @ W  (optionally + bias, ReLU)."""
    t = jnp.dot(h_ref[...], w_ref[...], preferred_element_type=jnp.float32)
    if fuse_bias_relu:
        t = jnp.maximum(t + b_ref[...], 0.0)
    o_ref[...] = t.astype(o_ref.dtype)


def _aggregate_kernel(a_ref, t_ref, b_ref, o_ref, acc_ref, *, fuse_bias_relu):
    """Row-tiled, k-tiled  A @ T  with fp32 accumulator (optionally + bias, ReLU)."""
    k = pl.program_id(1)

    @pl.when(k == 0)
    def _():
        acc_ref[...] = jnp.zeros_like(acc_ref)

    acc_ref[...] += jnp.dot(a_ref[...], t_ref[...],
                            preferred_element_type=jnp.float32)

    @pl.when(k == pl.num_programs(1) - 1)
    def _():
        h = acc_ref[...]
        if fuse_bias_relu:
            h = jnp.maximum(h + b_ref[...], 0.0)
        o_ref[...] = h.astype(o_ref.dtype)


# ---------------------------------------------------------------------------
# pallas_call wrappers
# ---------------------------------------------------------------------------
def _transform(h_p, w_p, b_p, fuse_bias_relu):
    n_p, cin_p = h_p.shape
    cout_p = w_p.shape[1]
    tm = _pick_tile(n_p, 256)
    kernel = functools.partial(_transform_kernel, fuse_bias_relu=fuse_bias_relu)
    return pl.pallas_call(
        kernel,
        out_shape=jax.ShapeDtypeStruct((n_p, cout_p), jnp.bfloat16),
        grid_spec=pltpu.PrefetchScalarGridSpec(
            num_scalar_prefetch=0,
            grid=(n_p // tm,),
            in_specs=[
                pl.BlockSpec((tm, cin_p), lambda i: (i, 0)),      # H row tile
                pl.BlockSpec((cin_p, cout_p), lambda i: (0, 0)),  # W resident
                pl.BlockSpec((1, cout_p), lambda i: (0, 0)),      # bias
            ],
            out_specs=pl.BlockSpec((tm, cout_p), lambda i: (i, 0)),
        ),
        compiler_params=pltpu.CompilerParams(
            dimension_semantics=("parallel",),
            vmem_limit_bytes=_vmem_limit_bytes(),
        ),
    )(h_p, w_p, b_p)


def _aggregate(a_p, t_p, b_p, fuse_bias_relu):
    n_p = a_p.shape[0]
    c_p = t_p.shape[1]
    tm = _pick_tile(n_p, 256)   # MXU-friendly M tile
    tk = _pick_tile(n_p, 512)   # big K tile to amortize per-step overhead
    kernel = functools.partial(_aggregate_kernel, fuse_bias_relu=fuse_bias_relu)
    return pl.pallas_call(
        kernel,
        out_shape=jax.ShapeDtypeStruct((n_p, c_p), jnp.bfloat16),
        grid_spec=pltpu.PrefetchScalarGridSpec(
            num_scalar_prefetch=0,
            grid=(n_p // tm, n_p // tk),
            in_specs=[
                pl.BlockSpec((tm, tk), lambda i, k: (i, k)),   # stream A tiles
                pl.BlockSpec((tk, c_p), lambda i, k: (k, 0)),  # T k-tile
                pl.BlockSpec((1, c_p), lambda i, k: (0, 0)),   # bias
            ],
            out_specs=pl.BlockSpec((tm, c_p), lambda i, k: (i, 0)),
            scratch_shapes=[pltpu.VMEM((tm, c_p), jnp.float32)],
        ),
        compiler_params=pltpu.CompilerParams(
            dimension_semantics=("parallel", "arbitrary"),
            vmem_limit_bytes=_vmem_limit_bytes(),
        ),
    )(a_p, t_p, b_p)


# ---------------------------------------------------------------------------
# GCN forward
# ---------------------------------------------------------------------------
def _gcn_layer(a_p, h_p, w, b):
    """relu(A @ (H @ W) + b) with trace-time choice of matmul ordering."""
    n_p, cin_p = h_p.shape
    cout_p = _round_up(w.shape[1], LANE)
    w_p = jnp.pad(w.astype(jnp.float32),
                  ((0, cin_p - w.shape[0]), (0, cout_p - w.shape[1]))
                  ).astype(jnp.bfloat16)
    b_p = jnp.pad(b.reshape(1, -1).astype(jnp.float32),
                  ((0, 0), (0, cout_p - w.shape[1])))

    if cin_p <= cout_p:
        # aggregate-first: AGG = A @ H, then relu(AGG @ W + b)
        zero_b = jnp.zeros((1, cin_p), jnp.float32)
        agg = _aggregate(a_p, h_p, zero_b, fuse_bias_relu=False)
        return _transform(agg, w_p, b_p, fuse_bias_relu=True)
    else:
        # transform-first: T = H @ W, then relu(A @ T + b)
        t = _transform(h_p, w_p, b_p, fuse_bias_relu=False)
        return _aggregate(a_p, t, b_p, fuse_bias_relu=True)


def gcn_forward(a_hat, x, params):
    n, d_in = x.shape
    d_out = params[-1][0].shape[1]

    n_p = _round_up(max(n, LANE), LANE)
    cin_p = _round_up(d_in, LANE)

    a_p = jnp.pad(a_hat, ((0, n_p - n), (0, n_p - n))).astype(jnp.bfloat16)
    h = jnp.pad(x, ((0, n_p - n), (0, cin_p - d_in))).astype(jnp.bfloat16)

    for w, b in params:
        h = _gcn_layer(a_p, h, w, b)

    return h[:n, :d_out].astype(jnp.float32)


# ---------------------------------------------------------------------------
# Host-side helpers & references
# ---------------------------------------------------------------------------
def build_normalized_adjacency(edge_index, num_nodes):
    """Dense D^-1/2 (A + I) D^-1/2, matching PyG gcn_norm(add_self_loops=True)."""
    src, dst = edge_index[0], edge_index[1]
    a = jnp.zeros((num_nodes, num_nodes), dtype=jnp.float32)
    a = a.at[dst, src].add(1.0)
    a = a + jnp.eye(num_nodes, dtype=jnp.float32)
    deg = a.sum(axis=1)
    dinv = jnp.where(deg > 0, jax.lax.rsqrt(deg), 0.0)
    return dinv[:, None] * a * dinv[None, :]


def glorot(key, fan_in, fan_out):
    lim = jnp.sqrt(6.0 / (fan_in + fan_out))
    return jax.random.uniform(key, (fan_in, fan_out), jnp.float32, -lim, lim)


def reference_forward_fp32(a_hat, x, params):
    h = x
    for w, b in params:
        h = jnp.maximum(a_hat @ (h @ w) + b.reshape(1, -1), 0.0)
    return h


def reference_forward_bf16_mirror(a_hat, x, params):
    """Mirrors the kernel's dtype handling and per-layer matmul ordering."""
    bf16 = jnp.bfloat16
    a = a_hat.astype(bf16)
    h = x.astype(bf16)
    for w, b in params:
        cin_p = _round_up(w.shape[0], LANE)
        cout_p = _round_up(w.shape[1], LANE)
        wb = w.astype(bf16)
        bf = b.reshape(1, -1).astype(jnp.float32)
        if cin_p <= cout_p:   # aggregate-first
            agg = jnp.dot(a, h, preferred_element_type=jnp.float32).astype(bf16)
            y = jnp.dot(agg, wb, preferred_element_type=jnp.float32)
        else:                 # transform-first
            t = jnp.dot(h, wb, preferred_element_type=jnp.float32).astype(bf16)
            y = jnp.dot(a, t, preferred_element_type=jnp.float32)
        h = jnp.maximum(y + bf, 0.0).astype(bf16)
    return h.astype(jnp.float32)


if __name__ == "__main__":
    N = 24            # number of graph nodes
    LATDIM = 128      # args.latdim
    HID = LATDIM * 2  # hidden width (exercises both matmul orderings)

    key = jax.random.PRNGKey(0)
    kx, ke, k1, k2, k3, kb1, kb2, kb3 = jax.random.split(key, 8)

    # deterministic node features
    x = jax.random.normal(kx, (N, LATDIM), dtype=jnp.float32)

    # deterministic edge_index (2, E): a ring plus a few chords
    ring_src = jnp.arange(N)
    ring_dst = (jnp.arange(N) + 1) % N
    extra_src = jax.random.randint(ke, (12,), 0, N)
    extra_dst = (extra_src + 5) % N
    src = jnp.concatenate([ring_src, ring_dst, extra_src])
    dst = jnp.concatenate([ring_dst, ring_src, extra_dst])
    edge_index = jnp.stack([src, dst], axis=0)

    a_hat = build_normalized_adjacency(edge_index, N)

    # parameters (GCNConv: weight (in, out), small deterministic biases)
    params = (
        (glorot(k1, LATDIM, HID), 0.1 * jax.random.normal(kb1, (HID,), jnp.float32)),
        (glorot(k2, HID, HID),    0.1 * jax.random.normal(kb2, (HID,), jnp.float32)),
        (glorot(k3, HID, LATDIM), 0.1 * jax.random.normal(kb3, (LATDIM,), jnp.float32)),
    )

    out = gcn_forward(a_hat, x, params)
    out = jax.block_until_ready(out)
    assert out.shape == (N, LATDIM)

    # 1) dtype-mirrored reference (same quantization points -> tight match)
    ref_bf = reference_forward_bf16_mirror(a_hat, x, params)
    assert jnp.allclose(out, ref_bf, atol=2e-2, rtol=2e-2), \
        float(jnp.max(jnp.abs(out - ref_bf)))

    # 2) pure fp32 semantic reference (loose tolerance for bf16 operands)
    ref32 = reference_forward_fp32(a_hat, x, params)
    assert jnp.allclose(out, ref32, atol=8e-2, rtol=8e-2), \
        float(jnp.max(jnp.abs(out - ref32)))

    print("KERNEL_OK")
</pallas_src>

<mosaic_0001>
module attributes {stable_mosaic.version = 11 : i64} {
  func.func @_aggregate_kernel(%arg0: i32, %arg1: i32, %arg2: memref<128x128xbf16, #tpu.memory_space<vmem>>, %arg3: memref<128x128xbf16, #tpu.memory_space<vmem>>, %arg4: memref<1x128xf32, #tpu.memory_space<vmem>>, %arg5: memref<128x128xbf16, #tpu.memory_space<vmem>>, %arg6: memref<128x128xf32, #tpu.memory_space<vmem>>) attributes {dimension_semantics = [#tpu.dimension_semantics<parallel>, #tpu.dimension_semantics<arbitrary>], iteration_bounds = array<i64: 1, 1>, scalar_prefetch = 0 : i64, scratch_operands = 1 : i64, tpu.core_type = #tpu.core_type<tc>, window_params = [{transform_indices = @transform_0, window_bounds = array<i64: 128, 128>}, {transform_indices = @transform_1, window_bounds = array<i64: 128, 128>}, {pipeline_mode = #tpu.pipeline_mode<synchronous>, transform_indices = @transform_2, window_bounds = array<i64: 1, 128>}, {transform_indices = @transform_3, window_bounds = array<i64: 128, 128>}]} {
    %c0_i32 = arith.constant 0 : i32
    %0 = arith.cmpi eq, %arg1, %c0_i32 : i32
    %1 = arith.extui %0 : i1 to i32
    %c0_i32_0 = arith.constant 0 : i32
    %2 = arith.cmpi ne, %1, %c0_i32_0 : i32
    scf.if %2 {
      %cst_10 = arith.constant 0.000000e+00 : f32
      %12 = vector.broadcast %cst_10 : f32 to vector<128x128xf32>
      %c0_11 = arith.constant 0 : index
      %c0_12 = arith.constant 0 : index
      %13 = vector.load %arg6[%c0_11, %c0_12] : memref<128x128xf32, #tpu.memory_space<vmem>>, vector<128x128xf32>
      tpu.vector_store %arg6[%c0_11, %c0_12], %12 {strides = array<i32>} : memref<128x128xf32, #tpu.memory_space<vmem>>, vector<128x128xf32>,
    } else {
    }
    %c0 = arith.constant 0 : index
    %c0_1 = arith.constant 0 : index
    %3 = vector.load %arg6[%c0, %c0_1] : memref<128x128xf32, #tpu.memory_space<vmem>>, vector<128x128xf32>
    %c0_2 = arith.constant 0 : index
    %c0_3 = arith.constant 0 : index
    %4 = vector.load %arg2[%c0_2, %c0_3] : memref<128x128xbf16, #tpu.memory_space<vmem>>, vector<128x128xbf16>
    %c0_4 = arith.constant 0 : index
    %c0_5 = arith.constant 0 : index
    %5 = vector.load %arg3[%c0_4, %c0_5] : memref<128x128xbf16, #tpu.memory_space<vmem>>, vector<128x128xbf16>
    %cst = arith.constant dense<0.000000e+00> : vector<128x128xf32>
    %6 = tpu.matmul %4, %5, %cst {dimension_numbers = #tpu.dot_dimension_numbers<[1], [0], [0], [1], [0, 0, 1, 1], [], []>} : vector<128x128xbf16>, vector<128x128xbf16>, vector<128x128xf32> -> vector<128x128xf32>
    %7 = arith.addf %3, %6 : vector<128x128xf32>
    %c0_6 = arith.constant 0 : index
    %c0_7 = arith.constant 0 : index
    %8 = vector.load %arg6[%c0_6, %c0_7] : memref<128x128xf32, #tpu.memory_space<vmem>>, vector<128x128xf32>
    tpu.vector_store %arg6[%c0_6, %c0_7], %7 {strides = array<i32>} : memref<128x128xf32, #tpu.memory_space<vmem>>, vector<128x128xf32>,
    %c0_i32_8 = arith.constant 0 : i32
    %9 = arith.cmpi eq, %arg1, %c0_i32_8 : i32
    %10 = arith.extui %9 : i1 to i32
    %c0_i32_9 = arith.constant 0 : i32
    %11 = arith.cmpi ne, %10, %c0_i32_9 : i32
    scf.if %11 {
      %c0_10 = arith.constant 0 : index
      %c0_11 = arith.constant 0 : index
      %12 = vector.load %arg6[%c0_10, %c0_11] : memref<128x128xf32, #tpu.memory_space<vmem>>, vector<128x128xf32>
      %13 = arith.truncf %12 : vector<128x128xf32> to vector<128x128xbf16>
      %c0_12 = arith.constant 0 : index
      %c0_13 = arith.constant 0 : index
      %14 = vector.load %arg5[%c0_12, %c0_13] : memref<128x128xbf16, #tpu.memory_space<vmem>>, vector<128x128xbf16>
      tpu.vector_store %arg5[%c0_12, %c0_13], %13 {strides = array<i32>} : memref<128x128xbf16, #tpu.memory_space<vmem>>, vector<128x128xbf16>,
    } else {
    }
    return
  }
  func.func @transform_0(%arg0: i32, %arg1: i32) -> (i32, i32) {
    %c0_i32 = arith.constant 0 : i32
    return %arg0, %arg1 : i32, i32
  }
  func.func @transform_1(%arg0: i32, %arg1: i32) -> (i32, i32) {
    %c0_i32 = arith.constant 0 : i32
    %c0_i32_0 = arith.constant 0 : i32
    return %arg1, %c0_i32 : i32, i32
  }
  func.func @transform_2(%arg0: i32, %arg1: i32) -> (i32, i32) {
    %c0_i32 = arith.constant 0 : i32
    %c0_i32_0 = arith.constant 0 : i32
    %c0_i32_1 = arith.constant 0 : i32
    return %c0_i32, %c0_i32_0 : i32, i32
  }
  func.func @transform_3(%arg0: i32, %arg1: i32) -> (i32, i32) {
    %c0_i32 = arith.constant 0 : i32
    %c0_i32_0 = arith.constant 0 : i32
    return %arg0, %c0_i32 : i32, i32
  }
}

</mosaic_0001>

<bundles_post_ra>
// kernel: tpu_custom_call.1
= control target key start
LH: loop header
LB: loop body
LE: loop exit
PB: predicated region body
PF: predicated region fallthrough
CT: control target
= control target key end

     0   :  { %8 = vsyncpa [#allocation4], 0  ;;  %s776_s0 = inlined_call_operand.hbm [shape: bf16[128,128], index: 0, kind: input, shape index: {}]   ;;  %s777_s1 = inlined_call_operand.hbm [shape: bf16[128,128], index: 1, kind: input, shape index: {}]   ;;  %s778_s2 = inlined_call_operand.vmem [shape: f32[1,128], index: 2, kind: input, shape index: {}]   ;;  %s779_s3 = inlined_call_operand.hbm [shape: bf16[128,128], index: 3, kind: output, shape index: {}]  }
   0x1   :  { %9 = vsyncpa [#allocation7], 0 }
   0x2   :  { %10 = vsyncpa [#allocation5], 0  ;;  %s706_s12 = smov [#allocation3]   ;;  %s634_s16 = scalar_lea.hbm %s776_s0, 1024 }
   0x3   :  { %s16_s13 = sshll.u32 %s706_s12, 4  ;;  %p635_p0 = scmp.ne.s32.totalorder %s776_s0, %s634_s16  ;;  %s17_s13 = int_to_ptr.vmem [resolvable:$true] %s16_s13 }
   0x4   :  { %p638_p1 = scmp.lt.u32.totalorder %s634_s16, %s776_s0 }
   0x6   :  { %p640_p2 = pnand %p638_p1, %p635_p0 }
   0x8   :  { %643 = shalt.err (!%p640_p2)
}
   0x9   :  { %s644_s2 = scalar_lea.vmem %s17_s13, 1024  ;;  %p649_p4 = scmp.lt.s32.totalorder %s17_s13, %s17_s13 }
   0xa   :  { %p645_p3 = scmp.ne.s32.totalorder %s17_s13, %s644_s2  ;;  %p650_p5 = scmp.lt.s32.totalorder %s644_s2, %s644_s2 }
   0xc   :  { %p651_p6 = por %p650_p5, %p649_p4 }
   0xe   :  { %p652_p7 = pnand %p651_p6, %p645_p3 }
  0x10   :  { %655 = shalt.err (!%p652_p7)
}
  0x11   :  { %s707_s21 = smov 64   ;;  %s708_s22 = smov 4  }
  0x12   :  { %22 = dma.hbm_to_vmem [thread:$0]  %s776_s0, 1024, %s17_s13, [#allocation4], %s707_s21, %s707_s21, %s708_s22  }
  0x13   :  { %s709_s25 = smov [#allocation6]   ;;  %s656_s29 = scalar_lea.hbm %s777_s1, 1024 }
  0x14   :  { %s28_s26 = sshll.u32 %s709_s25, 4  ;;  %p657_p8 = scmp.ne.s32.totalorder %s777_s1, %s656_s29  ;;  %s29_s26 = int_to_ptr.vmem [resolvable:$true] %s28_s26 }
  0x15   :  { %p660_p9 = scmp.lt.u32.totalorder %s656_s29, %s777_s1 }
  0x17   :  { %p662_p10 = pnand %p660_p9, %p657_p8 }
  0x19   :  { %665 = shalt.err (!%p662_p10)
}
  0x1a   :  { %s666_s7 = scalar_lea.vmem %s29_s26, 1024  ;;  %p671_p12 = scmp.lt.s32.totalorder %s29_s26, %s29_s26 }
  0x1b   :  { %p667_p11 = scmp.ne.s32.totalorder %s29_s26, %s666_s7  ;;  %p672_p13 = scmp.lt.s32.totalorder %s666_s7, %s666_s7 }
  0x1d   :  { %p673_p0 = por %p672_p13, %p671_p12 }
  0x1f   :  { %p674_p1 = pnand %p673_p0, %p667_p11 }
  0x21   :  { %677 = shalt.err (!%p674_p1)
}
  0x22   :  { %34 = dma.hbm_to_vmem [thread:$0]  %s777_s1, 1024, %s29_s26, [#allocation7], %s707_s21, %s707_s21, %s708_s22  }
  0x23   :  { %700 = dma.done.wait [#allocation4], 1024  }
  0x24   :  { %701 = vsyncadd [#allocation4], 4294966272 }
  0x25   :  { %702 = dma.done.wait [#allocation7], 1024  }
  0x26   :  { %703 = vsyncadd [#allocation7], 4294966272  ;;  %v618_v0 = vld [vmem:[#allocation6] sm:$0xff]   ;;  %v619_v1 = vld [vmem:[#allocation6 + $0x8] sm:$0xff]   ;;  %s710_s1 = smov [#allocation8]  }
  0x27   :  { %565 = vmatprep.subr.bf16.mxu0 %v618_v0  ;;  %597 = vmatprep.subr.bf16.mxu1 %v618_v0  ;;  %v620_v2 = vld [vmem:[#allocation6 + $0x10] sm:$0xff]   ;;  %v621_v3 = vld [vmem:[#allocation6 + $0x18] sm:$0xff]   ;;  %v626_v4 = vld [vmem:[#allocation3] sm:$0xff]   ;;  %s441_s9 = sshll.u32 %s710_s1, 4  ;;  %s442_s9 = int_to_ptr.vmem [resolvable:$true] %s441_s9 }
  0x28   :  { %566 = vmatpush3.bf16.msra.mxu0 %v618_v0  ;;  %605 = vmatpush3.bf16.msra.mxu1 %v618_v0  ;;  %v627_v5 = vld [vmem:[#allocation3 + $0x20] sm:$0xff]   ;;  %v623_v7 = vld [vmem:[#allocation6 + $0x28] sm:$0xff]   ;;  %v624_v8 = vld [vmem:[#allocation6 + $0x30] sm:$0xff]   ;;  %s678_s10 = scalar_lea.vmem %s442_s9, 1024  ;;  %p683_p3 = scmp.lt.s32.totalorder %s442_s9, %s442_s9 }
  0x29   :  { %567 = vmatprep.subr.bf16.mxu0 %v619_v1  ;;  %598 = vmatprep.subr.bf16.mxu1 %v619_v1  ;;  %v622_v6 = vld [vmem:[#allocation6 + $0x20] sm:$0xff]   ;;  %v625_v9 = vld [vmem:[#allocation6 + $0x38] sm:$0xff]   ;;  %v628_v10 = vld [vmem:[#allocation3 + $0x8] sm:$0xff]   ;;  %p679_p2 = scmp.ne.s32.totalorder %s442_s9, %s678_s10  ;;  %p684_p4 = scmp.lt.s32.totalorder %s678_s10, %s678_s10 }
  0x2a   :  { %581 = vmatprep.mubr.bf16.mxu0 %v626_v4  ;;  %589 = vmatprep.mubr.bf16.mxu1 %v627_v5  ;;  %v629_v11 = vld [vmem:[#allocation3 + $0x28] sm:$0xff]   ;;  %v630_v12 = vld [vmem:[#allocation3 + $0x10] sm:$0xff]   ;;  %v632_v14 = vld [vmem:[#allocation3 + $0x18] sm:$0xff]  }
  0x2b   :  { %v631_v13 = vld [vmem:[#allocation3 + $0x30] sm:$0xff]   ;;  %v633_v15 = vld [vmem:[#allocation3 + $0x38] sm:$0xff]   ;;  %p685_p5 = por %p684_p4, %p683_p3 }
  0x2c   :  { %568 = vmatpush3.bf16.msra.mxu0 %v619_v1  ;;  %606 = vmatpush3.bf16.msra.mxu1 %v619_v1 }
  0x2d   :  { %569 = vmatprep.subr.bf16.mxu0 %v620_v2  ;;  %599 = vmatprep.subr.bf16.mxu1 %v620_v2  ;;  %p686_p6 = pnand %p685_p5, %p679_p2 }
  0x30   :  { %570 = vmatpush3.bf16.msra.mxu0 %v620_v2  ;;  %607 = vmatpush3.bf16.msra.mxu1 %v620_v2 }
  0x31   :  { %571 = vmatprep.subr.bf16.mxu0 %v621_v3  ;;  %600 = vmatprep.subr.bf16.mxu1 %v621_v3 }
  0x34   :  { %572 = vmatpush3.bf16.msra.mxu0 %v621_v3  ;;  %608 = vmatpush3.bf16.msra.mxu1 %v621_v3 }
  0x35   :  { %573 = vmatprep.subr.bf16.mxu0 %v622_v6  ;;  %601 = vmatprep.subr.bf16.mxu1 %v622_v6 }
  0x38   :  { %574 = vmatpush3.bf16.msra.mxu0 %v622_v6  ;;  %609 = vmatpush3.bf16.msra.mxu1 %v622_v6 }
  0x39   :  { %575 = vmatprep.subr.bf16.mxu0 %v623_v7  ;;  %602 = vmatprep.subr.bf16.mxu1 %v623_v7 }
  0x3c   :  { %576 = vmatpush3.bf16.msra.mxu0 %v623_v7  ;;  %610 = vmatpush3.bf16.msra.mxu1 %v623_v7 }
  0x3d   :  { %577 = vmatprep.subr.bf16.mxu0 %v624_v8  ;;  %603 = vmatprep.subr.bf16.mxu1 %v624_v8 }
  0x40   :  { %578 = vmatpush3.bf16.msra.mxu0 %v624_v8  ;;  %611 = vmatpush3.bf16.msra.mxu1 %v624_v8 }
  0x41   :  { %579 = vmatprep.subr.bf16.mxu0 %v625_v9  ;;  %604 = vmatprep.subr.bf16.mxu1 %v625_v9 }
  0x44   :  { %580 = vmatpush3.bf16.msra.mxu0 %v625_v9  ;;  %612 = vmatpush3.bf16.msra.mxu1 %v625_v9 }
  0x47   :  { %582 = vmatmul.mubr.bf16.vlgmr.msra.gmra.mrb[0].mxu0 %v628_v10  ;;  %590 = vmatmul.mubr.bf16.vlgmr.msra.gmra.mrb[0].mxu1 %v629_v11 }
  0x48   :  { %585 = vmatprep.mubr.bf16.mxu0 %v630_v12  ;;  %593 = vmatprep.mubr.bf16.mxu1 %v631_v13 }
  0x4f   :  { %586 = vmatmul.mubr.bf16.gmra.mrb[4].mxu0 %v632_v14  ;;  %594 = vmatmul.mubr.bf16.gmra.mrb[4].mxu1 %v633_v15 }
 0x11a   :  { %v583_v16 = vpop.f32.mrb[0].mxu0  ;;  %v591_v17 = vpop.f32.mrb[0].mxu1 }
 0x11b   :  { %v242_v18 = vpop.f32.mrb[1].mxu0  ;;  %v274_v19 = vpop.f32.mrb[1].mxu1 }
 0x11c   :  { %v584_v20 = vpop.f32.mrb[2].mxu0  ;;  %v592_v21 = vpop.f32.mrb[2].mxu1 }
 0x11d   :  { %v510_v22 = vpack.c.bf16 %v584_v20, %v583_v16  ;;  %v530_v23 = vpack.c.bf16 %v592_v21, %v591_v17  ;;  %v245_v24 = vpop.f32.mrb[3].mxu0  ;;  %v277_v25 = vpop.f32.mrb[3].mxu1 }
 0x11e   :  { %v505_v26 = vpack.c.bf16 %v245_v24, %v242_v18  ;;  %v525_v27 = vpack.c.bf16 %v277_v25, %v274_v19 }
 0x11f   :  { %542 = vst [vmem:[#allocation8 + $0x8] sm:$0xff] %v510_v22   ;;  %546 = vst [vmem:[#allocation8 + $0x28] sm:$0xff] %v530_v23  }
 0x120   :  { %506 = vst [vmem:[#allocation8] sm:$0xff] %v505_v26   ;;  %545 = vst [vmem:[#allocation8 + $0x20] sm:$0xff] %v525_v27  }
 0x122   :  { %v587_v28 = vpop.f32.mrb[4].mxu0  ;;  %v595_v29 = vpop.f32.mrb[4].mxu1 }
 0x123   :  { %v258_v30 = vpop.f32.mrb[5].mxu0  ;;  %v290_v31 = vpop.f32.mrb[5].mxu1 }
 0x124   :  { %v588_v32 = vpop.f32.mrb[6].mxu0  ;;  %v596_v33 = vpop.f32.mrb[6].mxu1 }
 0x125   :  { %v520_v34 = vpack.c.bf16 %v588_v32, %v587_v28  ;;  %v540_v35 = vpack.c.bf16 %v596_v33, %v595_v29  ;;  %v261_v36 = vpop.f32.mrb[7].mxu0  ;;  %v293_v37 = vpop.f32.mrb[7].mxu1 }
 0x126   :  { %v515_v38 = vpack.c.bf16 %v261_v36, %v258_v30  ;;  %v535_v39 = vpack.c.bf16 %v293_v37, %v290_v31 }
 0x127   :  { %544 = vst [vmem:[#allocation8 + $0x18] sm:$0xff] %v520_v34   ;;  %548 = vst [vmem:[#allocation8 + $0x38] sm:$0xff] %v540_v35  }
 0x128   :  { %543 = vst [vmem:[#allocation8 + $0x10] sm:$0xff] %v515_v38   ;;  %547 = vst [vmem:[#allocation8 + $0x30] sm:$0xff] %v535_v39  }
 0x129   :  { %689 = shalt.err (!%p686_p6)
}
 0x12a   :  { %s690_s13 = scalar_lea.hbm %s779_s3, 1024 }
 0x12b   :  { %p691_p7 = scmp.ne.s32.totalorder %s779_s3, %s690_s13  ;;  %p694_p8 = scmp.lt.u32.totalorder %s690_s13, %s779_s3 }
 0x12d   :  { %p696_p9 = pnand %p694_p8, %p691_p7 }
 0x12f   :  { %699 = shalt.err (!%p696_p9)
}
 0x130   :  { %447 = dma.vmem_to_hbm [thread:$0]  %s442_s9, 1024, %s779_s3, [#allocation5], %s707_s21, %s707_s21, %s708_s22  }
 0x131   :  { %704 = dma.done.wait [#allocation5], 1024  }
 0x132   :  { %705 = vsyncadd [#allocation5], 4294966272 }
 0x133   :  { %451 = vsyncpa [#allocation4], 1 }
 0x134   :  { %452 = vsyncpa [#allocation7], 1 }
 0x135   :  { %453 = vsyncpa [#allocation5], 1 }

</bundles_post_ra>
